<compile_context>
chip_gen: v5e
topology: v5e:2x2
jax: 0.10.0
libtpu: 0.0.40
codegen_flags: <defaults>
</compile_context>

<pallas_src>
import math

import jax
import jax.numpy as jnp
from jax import lax
from jax.experimental import pallas as pl
from jax.experimental.pallas import tpu as pltpu


def _round_up(n, m):
    return ((n + m - 1) // m) * m


def _conv_mm_kernel(x_ref, w_ref, b_ref, o_ref):
    # x_ref: (TT, KC_p)       im2col activation tile (compute dtype, e.g. bf16)
    # w_ref: (KC_p, C_out_p)  folded weights (compute dtype)
    # b_ref: (1, C_out_p)     f32 bias row
    # o_ref: (TT, C_out_p)    lane-dense output tile (signal dtype)
    acc = jnp.dot(x_ref[...], w_ref[...], preferred_element_type=jnp.float32)
    o_ref[...] = (acc + b_ref[...]).astype(o_ref.dtype)


def conv_norm_forward(signal, weight, bias=None, *, stride=1, padding=None,
                      dilation=1, compute_dtype=jnp.bfloat16,
                      max_time_tile=1024, vmem_budget_bytes=18 * 1024 * 1024):
    """ConvNorm forward: signal [B, C_in, T], weight [C_out, C_in, K], bias [C_out].
    Returns [B, C_out, T_out] with torch.nn.Conv1d semantics."""
    B, C_in, T = signal.shape
    C_out, C_in_w, K = weight.shape
    assert C_in_w == C_in
    if padding is None:
        assert K % 2 == 1
        padding = dilation * (K - 1) // 2
    out_dtype = signal.dtype
    if compute_dtype is None:
        compute_dtype = signal.dtype

    # ---- wrapper-side im2col (layout plumbing, single pass over activations) ----
    x_t = jnp.transpose(signal, (0, 2, 1))                           # (B, T, C_in)
    x_t = jnp.pad(x_t, ((0, 0), (padding, padding), (0, 0)))
    T_pad = T + 2 * padding
    T_out = (T_pad - dilation * (K - 1) - 1) // stride + 1
    cols = [
        x_t[:, k * dilation: k * dilation + (T_out - 1) * stride + 1: stride, :]
        for k in range(K)
    ]
    x_win = jnp.concatenate(cols, axis=-1).astype(compute_dtype)     # (B, T_out, K*C_in)

    KC = K * C_in
    KC_p = _round_up(KC, 128)          # contraction depth, lane-dense (>=256 for big layers)
    C_out_p = _round_up(C_out, 128)    # lane-dense output channels

    # Weights folded to (K*C_in, C_out) with the same (k, c) column ordering as x_win.
    w2 = jnp.transpose(weight, (2, 1, 0)).reshape(KC, C_out)
    w2 = jnp.pad(w2, ((0, KC_p - KC), (0, C_out_p - C_out))).astype(compute_dtype)
    if bias is None:
        bias = jnp.zeros((C_out,), jnp.float32)
    b2 = jnp.pad(bias.astype(jnp.float32), (0, C_out_p - C_out)).reshape(1, C_out_p)

    # ---- time-tile sizing against a VMEM budget (double-buffered blocks) ----
    x_isz = jnp.dtype(compute_dtype).itemsize
    o_isz = jnp.dtype(out_dtype).itemsize
    align = 16 if x_isz < 4 else 8                      # native sublane tiling for packed dtypes
    fixed = 2 * KC_p * C_out_p * x_isz + 2 * C_out_p * 4            # weights + bias buffers
    per_row = 2 * KC_p * x_isz + 2 * C_out_p * o_isz                # x tile + out tile buffers
    tt = (vmem_budget_bytes - fixed) // max(per_row, 1)
    tt = min(tt, max_time_tile, _round_up(T_out, align))
    TT = int(max(align, (tt // align) * align))
    T_out_p = _round_up(T_out, TT)
    n_t = T_out_p // TT

    x_win = jnp.pad(x_win, ((0, 0), (0, T_out_p - T_out), (0, KC_p - KC)))

    vmem_limit = int(max(32 * 1024 * 1024, fixed + TT * per_row + (4 << 20)))

    out_tm = pl.pallas_call(
        _conv_mm_kernel,
        out_shape=jax.ShapeDtypeStruct((B, T_out_p, C_out_p), out_dtype),
        grid=(B, n_t),
        in_specs=[
            # batch dim squeezed out of the kernel view (None == pl.Squeezed())
            pl.BlockSpec((None, TT, KC_p), lambda b, t: (b, t, 0)),
            pl.BlockSpec((KC_p, C_out_p), lambda b, t: (0, 0)),
            pl.BlockSpec((1, C_out_p), lambda b, t: (0, 0)),
        ],
        out_specs=pl.BlockSpec((None, TT, C_out_p), lambda b, t: (b, t, 0)),
        compiler_params=pltpu.CompilerParams(
            dimension_semantics=("parallel", "parallel"),
            vmem_limit_bytes=vmem_limit,
        ),
    )(x_win, w2, b2)

    out = out_tm[:, :T_out, :C_out]                                  # (B, T_out, C_out)
    return jnp.transpose(out, (0, 2, 1))                             # (B, C_out, T_out)


def xavier_uniform_conv1d(key, c_out, c_in, k, gain=1.0, dtype=jnp.float32):
    # torch.nn.init.xavier_uniform_ on a Conv1d weight (C_out, C_in, K);
    # calculate_gain('linear') == 1.0
    fan_in = c_in * k
    fan_out = c_out * k
    a = gain * math.sqrt(6.0 / (fan_in + fan_out))
    return jax.random.uniform(key, (c_out, c_in, k), dtype, minval=-a, maxval=a)


if __name__ == "__main__":
    key = jax.random.PRNGKey(0)
    k_x, k_w, k_b = jax.random.split(key, 3)

    # Small shapes consistent with the module's typical use.
    batch, in_ch, out_ch, T = 2, 4, 32, 16
    kernel_size, stride, dilation = 3, 1, 1

    signal = jax.random.normal(k_x, (batch, in_ch, T), jnp.float32)
    weight = xavier_uniform_conv1d(k_w, out_ch, in_ch, kernel_size, gain=1.0)
    bias = jax.random.uniform(k_b, (out_ch,), jnp.float32, minval=-0.1, maxval=0.1)

    out = conv_norm_forward(signal, weight, bias, stride=stride, dilation=dilation)
    out = jax.block_until_ready(out)

    # Pure-JAX references for torch.nn.Conv1d semantics.
    pad = dilation * (kernel_size - 1) // 2
    conv_kwargs = dict(window_strides=(stride,), padding=[(pad, pad)],
                       rhs_dilation=(dilation,),
                       dimension_numbers=("NCH", "OIH", "NCH"))
    ref_hi = lax.conv_general_dilated(signal, weight,
                                      precision=lax.Precision.HIGHEST,
                                      **conv_kwargs) + bias[None, :, None]
    # Precision-matched reference (bf16 inputs, f32 accumulation) for a tight check.
    ref_bf = lax.conv_general_dilated(signal.astype(jnp.bfloat16),
                                      weight.astype(jnp.bfloat16),
                                      preferred_element_type=jnp.float32,
                                      **conv_kwargs) + bias[None, :, None]

    assert out.shape == ref_hi.shape, (out.shape, ref_hi.shape)
    assert out.dtype == signal.dtype
    err_bf = float(jnp.max(jnp.abs(out - ref_bf)))
    err_hi = float(jnp.max(jnp.abs(out - ref_hi)))
    assert jnp.allclose(out, ref_bf, atol=1e-2, rtol=1e-2), \
        f"mismatch vs precision-matched reference, max abs err={err_bf}"
    assert jnp.allclose(out, ref_hi, atol=6e-2, rtol=6e-2), \
        f"mismatch vs f32 reference, max abs err={err_hi}"

    print("KERNEL_OK")
</pallas_src>

<mosaic_0001>
module attributes {stable_mosaic.version = 11 : i64} {
  func.func @_conv_mm_kernel(%arg0: i32, %arg1: i32, %arg2: memref<1x16x128xbf16, #tpu.memory_space<vmem>>, %arg3: memref<128x128xbf16, #tpu.memory_space<vmem>>, %arg4: memref<1x128xf32, #tpu.memory_space<vmem>>, %arg5: memref<1x16x128xf32, #tpu.memory_space<vmem>>) attributes {dimension_semantics = [#tpu.dimension_semantics<parallel>, #tpu.dimension_semantics<parallel>], iteration_bounds = array<i64: 2, 1>, scalar_prefetch = 0 : i64, scratch_operands = 0 : i64, tpu.core_type = #tpu.core_type<tc>, window_params = [{transform_indices = @transform_0, window_bounds = array<i64: 1, 16, 128>}, {pipeline_mode = #tpu.pipeline_mode<synchronous>, transform_indices = @transform_1, window_bounds = array<i64: 128, 128>}, {pipeline_mode = #tpu.pipeline_mode<synchronous>, transform_indices = @transform_2, window_bounds = array<i64: 1, 128>}, {transform_indices = @transform_3, window_bounds = array<i64: 1, 16, 128>}]} {
    %c0 = arith.constant 0 : index
    %c0_0 = arith.constant 0 : index
    %c0_1 = arith.constant 0 : index
    %0 = vector.load %arg2[%c0, %c0_0, %c0_1] : memref<1x16x128xbf16, #tpu.memory_space<vmem>>, vector<1x16x128xbf16>
    %1 = vector.shape_cast %0 : vector<1x16x128xbf16> to vector<16x128xbf16>
    %c0_2 = arith.constant 0 : index
    %c0_3 = arith.constant 0 : index
    %2 = vector.load %arg3[%c0_2, %c0_3] : memref<128x128xbf16, #tpu.memory_space<vmem>>, vector<128x128xbf16>
    %cst = arith.constant dense<0.000000e+00> : vector<16x128xf32>
    %3 = tpu.matmul %1, %2, %cst {dimension_numbers = #tpu.dot_dimension_numbers<[1], [0], [0], [1], [0, 0, 1, 1], [], []>} : vector<16x128xbf16>, vector<128x128xbf16>, vector<16x128xf32> -> vector<16x128xf32>
    %c0_4 = arith.constant 0 : index
    %c0_5 = arith.constant 0 : index
    %4 = vector.load %arg4[%c0_4, %c0_5] : memref<1x128xf32, #tpu.memory_space<vmem>>, vector<1x128xf32>
    %5 = vector.broadcast %4 : vector<1x128xf32> to vector<16x128xf32>
    %6 = arith.addf %3, %5 : vector<16x128xf32>
    %c0_6 = arith.constant 0 : index
    %c0_7 = arith.constant 0 : index
    %c0_8 = arith.constant 0 : index
    %7 = vector.load %arg5[%c0_6, %c0_7, %c0_8] : memref<1x16x128xf32, #tpu.memory_space<vmem>>, vector<1x16x128xf32>
    %8 = vector.shape_cast %7 : vector<1x16x128xf32> to vector<16x128xf32>
    %9 = vector.shape_cast %6 : vector<16x128xf32> to vector<1x16x128xf32>
    tpu.vector_store %arg5[%c0_6, %c0_7, %c0_8], %9 {strides = array<i32>} : memref<1x16x128xf32, #tpu.memory_space<vmem>>, vector<1x16x128xf32>,
    return
  }
  func.func @transform_0(%arg0: i32, %arg1: i32) -> (i32, i32, i32) {
    %c0_i32 = arith.constant 0 : i32
    %c0_i32_0 = arith.constant 0 : i32
    return %arg0, %arg1, %c0_i32 : i32, i32, i32
  }
  func.func @transform_1(%arg0: i32, %arg1: i32) -> (i32, i32) {
    %c0_i32 = arith.constant 0 : i32
    %c0_i32_0 = arith.constant 0 : i32
    %c0_i32_1 = arith.constant 0 : i32
    return %c0_i32, %c0_i32_0 : i32, i32
  }
  func.func @transform_2(%arg0: i32, %arg1: i32) -> (i32, i32) {
    %c0_i32 = arith.constant 0 : i32
    %c0_i32_0 = arith.constant 0 : i32
    %c0_i32_1 = arith.constant 0 : i32
    return %c0_i32, %c0_i32_0 : i32, i32
  }
  func.func @transform_3(%arg0: i32, %arg1: i32) -> (i32, i32, i32) {
    %c0_i32 = arith.constant 0 : i32
    %c0_i32_0 = arith.constant 0 : i32
    return %arg0, %arg1, %c0_i32 : i32, i32, i32
  }
}

</mosaic_0001>

<bundles_post_ra>
// kernel: tpu_custom_call.1
= control target key start
LH: loop header
LB: loop body
LE: loop exit
PB: predicated region body
PF: predicated region fallthrough
CT: control target
= control target key end

     0   :  { %s909_s0 = inlined_call_operand.hbm [shape: bf16[2,16,128], index: 0, kind: input, shape index: {}]   ;;  %s910_s1 = inlined_call_operand.hbm [shape: bf16[128,128], index: 1, kind: input, shape index: {}]   ;;  %s911_s2 = inlined_call_operand.vmem [shape: f32[1,128], index: 2, kind: input, shape index: {}]   ;;  %s912_s3 = inlined_call_operand.hbm [shape: f32[2,16,128], index: 3, kind: output, shape index: {}]  }
   0x1   :  { %914 = sst [smem:[#allocation11_spill]] %s910_s1 }
   0x2   :  { %8 = vsyncpa [#allocation3], 0 }
   0x3   :  { %10 = vsyncpa [#allocation3 + $0x1], 0 }
   0x4   :  { %11 = vsyncpa [#allocation6], 0 }
   0x5   :  { %12 = vsyncpa [#allocation4], 0 }
   0x6   :  { %14 = vsyncpa [#allocation4 + $0x1], 0  ;;  %s750_s12 = smov 0   ;;  %s752_s13 = smov 0  }
   0x7   :  { %s754_s14 = smov 0   ;;  %s756_s15 = smov 0  }
   0x8   :  { %s758_s16 = smov 0   ;;  %s760_s17 = smov 0  }
   0x9 LB: > { %s435_s18 = sadd.s32 4294967295, %s723_s17   ;;  %s436_s19 = sadd.s32 4294967294, %s723_s17   ;;  %s723_s17 = sphi %s760_s17, %s20_s17   ;;  %s719_s16 = sphi %s758_s16, %s928_s16   ;;  %s715_s15 = sphi %s756_s15, %s927_s15   ;;  %s711_s14 = sphi %s754_s14, %s926_s14   ;;  %s707_s13 = sphi %s752_s13, %s925_s13   ;;  %s703_s12 = sphi %s750_s12, %s924_s12  }
   0xa   : > { %p54_p0 = scmp.ne.s32.totalorder %s707_s13, %s703_s12  ;;  %p784_p1 = scmp.eq.s32.totalorder %s435_s18, 0 }
   0xb   : > { %p788_p2 = scmp.eq.s32.totalorder %s435_s18, 1  ;;  %p128_p3 = scmp.eq.s32.totalorder %s436_s19, 1 }
   0xc   : > { %p794_p4 = por %p784_p1, %p54_p0  ;;  %p437_p5 = scmp.ge.s32.totalorder %s723_s17, 1 }
   0xd   : > { %p799_p6 = por %p128_p3, %p54_p0  ;;  %p135_p7 = scmp.lt.s32.totalorder %s723_s17, 3 }
   0xe   : > { %s919_s1 = sld [smem:[#allocation11_spill]]  ;;  %s725_s28 = smov [#allocation5]  }
   0xf   : > { %p807_p8 = pnand %p437_p5, %p135_p7  ;;  %s148_s29 = sshll.u32 %s725_s28, 4  ;;  %s149_s29 = int_to_ptr.vmem [resolvable:$true] %s148_s29 }
  0x10   : > { %p439_p11 = scmp.ge.s32.totalorder %s723_s17, 2  ;;  %s913_s30 = smov 64  }
  0x11   : > { %p507_p9 = pneg %p807_p8  ;;  %s727_s4 = smov 4  }
  0x12   : > { %s32_s5 = sadd.s32 1, %s719_s16  ;;  %s41_s6 = sadd.s32 1, %s711_s14 }
  0x13   : > { %p508_p10 = pnand %p507_p9, %p784_p1  ;;  %p34_p12 = scmp.ge.s32.totalorder %s32_s5, 2 }
  0x14   : > { %s146_s26 = sshll.u32 %s919_s1, 4  ;;  %p48_p13 = scmp.ne.s32.totalorder %s711_s14, %s707_s13  ;;  %s147_s26 = int_to_ptr.hbm [resolvable:$true] %s146_s26 }
  0x15   : > { %510 = dma.hbm_to_vmem [thread:$0]  (!%p508_p10), %s147_s26, 1024, %s149_s29, [#allocation6], %s913_s30, %s913_s30, %s727_s4  }
  0x16   : > { %p49_p0 = scmp.eq.s32.totalorder %s723_s17, 0  ;;  %s930_s5 = smov (%p34_p12, %s32_s5), 0 }
  0x17   : > { %p832_p5 = por %p788_p2, %p48_p13  ;;  %s36_s9 = ssub.s32 %s719_s16, %s930_s5 }
  0x18   : > { %p826_p3 = por %p49_p0, %p48_p13  ;;  %p520_p7 = scmp.lt.s32.totalorder %s723_s17, 2 }
  0x19   : > { %p39_p9 = scmp.eq.s32.totalorder %s36_s9, 0  ;;  %s165_s10 = sand.u32 1, %s711_s14  }
  0x1a   : > { %s440_s11 = sshll.u32 %s165_s10, 3  ;;  %s488_s19 = sshll.u32 %s719_s16, 3 }
  0x1b   : > { %s841_s18 = scalar_select %p39_p9, %s711_s14, %s41_s6  }
  0x1c   : > { %s176_s26 = scalar_lea.hbm %s909_s0, %s488_s19  ;;  %s169_s28 = scalar_lea.vmem [#allocation2], %s440_s11 }
  0x1d   : > { %s179_s29 = sshll.u32 %s169_s28, 4  ;;  %s177_s21 = sshll.u32 %s176_s26, 4  ;;  %s180_s29 = int_to_ptr.vmem [resolvable:$true] %s179_s29  ;;  %s178_s21 = int_to_ptr.hbm [resolvable:$true] %s177_s21 }
  0x1e   : > { %p512_p2 = pnand %p520_p7, %p826_p3  ;;  %s166_s30 = scalar_lea.sflag [#allocation3], %s165_s10 }
  0x1f   : > { %s923_s1 = smov 64   ;;  %191 = sbr.rel (%p807_p8) target bundleno = 211 (0xd3), region = 32 }
  0x20   : > { %514 = dma.hbm_to_vmem [thread:$0]  (!%p512_p2), %s178_s21, 128, %s180_s29, %s166_s30, %s923_s1, %s923_s1, %s727_s4  }
  0x21   : > { %s855_s6 = sand.u32 (!%p807_p8), 1, %s707_s13  }
  0x22   : > { %s444_s9 = sshll.u32 (!%p807_p8), %s855_s6, 3  ;;  %s194_s11 = scalar_lea.sflag (!%p807_p8), [#allocation3], %s855_s6 }
  0x23   : > { %s197_s19 = scalar_lea.vmem (!%p807_p8), [#allocation2], %s444_s9 }
  0x24   : > { %690 = dma.done.wait (%p794_p4), %s194_s11, 128  }
  0x25   : > { %692 = vsyncadd (%p794_p4), %s194_s11, 4294967168 }
  0x26   : > { %694 = dma.done.wait (%p784_p1), [#allocation6], 1024  }
  0x27   : > { %696 = vsyncadd (%p784_p1), [#allocation6], 4294966272  ;;  %v497_v0 = vld [vmem:[#allocation5 + $0x38] sm:$0xff]  ;;  %v496_v1 = vld [vmem:[#allocation5 + $0x30] sm:$0xff]  ;;  %s446_s1 = sshll.u32 %s855_s6, 4  ;;  %s498_s27 = sshll.u32 %s715_s15, 4 }
  0x28   : > { %304 = vmatpush.bf16.msra.mxu0 %v497_v0  ;;  %v495_v2 = vld [vmem:[#allocation5 + $0x28] sm:$0xff]  ;;  %v494_v3 = vld [vmem:[#allocation5 + $0x20] sm:$0xff]  ;;  %v493_v4 = vld [vmem:[#allocation5 + $0x18] sm:$0xff]  ;;  %s334_s7 = scalar_lea.hbm %s912_s3, %s498_s27  ;;  %s225_s10 = scalar_lea.vmem [#allocation7], %s446_s1 }
  0x29   : > { %v492_v5 = vld [vmem:[#allocation5 + $0x10] sm:$0xff]  ;;  %v491_v6 = vld [vmem:[#allocation5 + $0x8] sm:$0xff]  ;;  %v490_v7 = vld [vmem:[#allocation5] sm:$0xff]  ;;  %s335_s24 = sshll.u32 %s225_s10, 4  ;;  %s337_s25 = sshll.u32 %s334_s7, 4  ;;  %s336_s24 = int_to_ptr.vmem [resolvable:$true] %s335_s24  ;;  %s338_s25 = int_to_ptr.hbm [resolvable:$true] %s337_s25 }
  0x2a   : > { %v489_v8 = vld [vmem:[%s197_s19] sm:$0xff]  ;;  %s321_s26 = scalar_lea.sflag [#allocation4], %s855_s6  ;;  %s651_s28 = sshra.s32 %s338_s25, 4  ;;  %s652_s28 = int_to_ptr.hbm [resolvable:$true] %s651_s28 }
  0x2b   : > { %v576_v9 = vld [vmem:[%s911_s2] ss:$0 sm:$0xff]  ;;  %s653_s15 = scalar_lea.hbm %s652_s28, 16  ;;  %s657_s9 = scalar_lea.hbm %s912_s3, 32 }
  0x2c   : > { %305 = vmatpush.bf16.msra.mxu0 %v496_v1  ;;  %p654_p1 = scmp.ne.s32.totalorder %s652_s28, %s653_s15  ;;  %p658_p10 = scmp.lt.s32.totalorder %s652_s28, %s912_s3 }
  0x2d   : > { %p659_p12 = scmp.lt.s32.totalorder %s657_s9, %s653_s15 }
  0x2e   : > { %p655_p4 = pnand %p654_p1, %p832_p5 }
  0x2f   : > { %p660_p13 = por %p659_p12, %p658_p10 }
  0x30   : > { %306 = vmatpush.bf16.msra.mxu0 %v495_v2  ;;  %p656_p8 = pneg %p655_p4 }
  0x32   : > { %p661_p0 = pnand %p660_p13, %p656_p8 }
  0x34   : > { %307 = vmatpush.bf16.msra.mxu0 %v494_v3 }
  0x38   : > { %308 = vmatpush.bf16.msra.mxu0 %v493_v4 }
  0x3c   : > { %309 = vmatpush.bf16.msra.mxu0 %v492_v5 }
  0x40   : > { %310 = vmatpush.bf16.msra.mxu0 %v491_v6 }
  0x44   : > { %311 = vmatpush.bf16.msra.mxu0 %v490_v7 }
  0x47   : > { %312 = vmatmul.bf16.vlgmr.msra.gmra.mxu0 %v489_v8 }
  0xc4   : > { %v313_v10 = vpop.f32.mrf.mxu0 }
  0xc5   : > { %v314_v11 = vadd.f32 %v576_v9, %v313_v10 }
  0xc7   : > { %318 = vst [vmem:[%s225_s10] sm:$0xff] %v314_v11 }
  0xcc   : > { %v315_v12 = vpop.f32.mrf.mxu0 }
  0xcd   : > { %v316_v13 = vadd.f32 %v576_v9, %v315_v12 }
  0xcf   : > { %319 = vst [vmem:[%s225_s10 + $0x8] sm:$0xff] %v316_v13 }
  0xd0   : > { %664 = shalt.err (!%p661_p0)
}
  0xd1   : > { %s728_s6 = smov 128   ;;  %s729_s1 = smov 8  }
  0xd2   : > { %505 = dma.vmem_to_hbm [thread:$0]  (%p832_p5), %s336_s24, 256, %s338_s25, %s321_s26, %s728_s6, %s728_s6, %s729_s1  }
  0xd3 PF: > { %s352_s20 = sand.u32 1, %s703_s12   ;;  %p516_p3 = pnand %p439_p11, %p799_p6 }
  0xd4   : > { %s353_s22 = scalar_lea.sflag [#allocation4], %s352_s20 }
  0xd5   : > { %p517_p7 = pneg %p516_p3 }
  0xd7   : > { %698 = dma.done.wait (%p517_p7), %s353_s22, 256  }
  0xd8   : > { %700 = vsyncadd (%p517_p7), %s353_s22, 4294967040  ;;  %s20_s17 = sadd.s32 1, %s723_s17   ;;  %s924_s12 = smov %s707_s13 }
  0xd9   : > { %p17_p9 = scmp.ge.s32.totalorder %s20_s17, 4   ;;  %s925_s13 = smov %s711_s14 }
  0xda   : > { %s926_s14 = smov %s841_s18  ;;  %s927_s15 = smov %s719_s16 }
  0xdb   : > { %s928_s16 = smov %s930_s5  ;;  %19 = sbr.rel (!%p17_p9) target bundleno = 9 (0x9), region = 81 }
  0xe0   :  { %359 = vsyncpa [#allocation3], 1 }
  0xe1   :  { %361 = vsyncpa [#allocation3 + $0x1], 1 }
  0xe2   :  { %362 = vsyncpa [#allocation6], 1 }
  0xe3   :  { %363 = vsyncpa [#allocation4], 1 }
  0xe4   :  { %365 = vsyncpa [#allocation4 + $0x1], 1 }

</bundles_post_ra>
